<compile_context>
chip_gen: v7x
topology: tpu7x:2x2x1
jax: 0.10.0
libtpu: 0.0.40
codegen_flags: <defaults>
</compile_context>

<pallas_src>
import functools
import math

import jax
import jax.numpy as jnp
from jax import lax
from jax.experimental import pallas as pl
from jax.experimental.pallas import tpu as pltpu

# Small synthetic configuration (torch defaults were 1536 / 768 / 512 — scaled down).
STYLE_DIM = 32
SPATIAL_DIM = 16
HIDDEN_DIM = 32
HIDDEN_HALF = HIDDEN_DIM // 2
CONV1_OUT = 32
CONV2_OUT = 64
KH = KW = 3
N_TAPS = KH * KW

WSLAB_LANES = 128
# Weight-slab row groups, 16-row aligned for the bf16 (16, 128) tiling.
_GA_R0, _GA_R1 = 0, 32     # ws1 | ws2 | wf1a | wf2      (lanes 0:32 | 32:64 | 64:96 | 96:128)
_GB_R0, _GB_R1 = 32, 96    # wd (64x16, lanes 0:16) | wf1b (16x32, lanes 32:64) | wc1t_aug (32x10, lanes 64:74)
_GC_R0, _GC_R1 = 96, 112   # bias rows: row0 = bs1|bs2|bf1|bf2 ; row1 = bc2|bd
WSLAB_ROWS = _GC_R1


# ----------------------------------------------------------------------------- host-side packing
def _pack_weight_slab(params):
    """All small weights/biases in one densely packed (112, 128) bf16 slab (1 resident DMA)."""
    wc1t_aug = jnp.concatenate(
        [params["wc1_4d"].reshape(N_TAPS, CONV1_OUT).T,           # (32, 9)
         params["bc1"].reshape(CONV1_OUT, 1)], axis=1)            # conv1 bias column -> (32, 10)
    slab = jnp.zeros((WSLAB_ROWS, WSLAB_LANES), jnp.float32)
    slab = slab.at[_GA_R0:_GA_R1, 0:32].set(params["ws1"])
    slab = slab.at[_GA_R0:_GA_R1, 32:64].set(params["ws2"])
    slab = slab.at[_GA_R0:_GA_R1, 64:96].set(params["wf1"][:HIDDEN_DIM, :])
    slab = slab.at[_GA_R0:_GA_R1, 96:128].set(params["wf2"])
    slab = slab.at[_GB_R0:_GB_R0 + CONV2_OUT, 0:HIDDEN_HALF].set(params["wd"])
    slab = slab.at[_GB_R0:_GB_R0 + HIDDEN_HALF, 32:64].set(params["wf1"][HIDDEN_DIM:, :])
    slab = slab.at[_GB_R0:_GB_R0 + CONV1_OUT, 64:64 + N_TAPS + 1].set(wc1t_aug)
    slab = slab.at[_GC_R0 + 0, 0:32].set(params["bs1"].reshape(-1))
    slab = slab.at[_GC_R0 + 0, 32:64].set(params["bs2"].reshape(-1))
    slab = slab.at[_GC_R0 + 0, 64:96].set(params["bf1"].reshape(-1))
    slab = slab.at[_GC_R0 + 0, 96:128].set(params["bf2"].reshape(-1))
    slab = slab.at[_GC_R0 + 1, 0:64].set(params["bc2"].reshape(-1))
    slab = slab.at[_GC_R0 + 1, 64:64 + HIDDEN_HALF].set(params["bd"].reshape(-1))
    return slab.astype(jnp.bfloat16)


def _pack_conv2_weights(params):
    """conv2 weights as a lane-dense (32, 9*64) bf16 slab: column index = tap*64 + c_out."""
    w = jnp.transpose(params["wc2_4d"], (2, 0, 1, 3))              # (Cin, KH, KW, Cout)
    return w.reshape(CONV1_OUT, N_TAPS * CONV2_OUT).astype(jnp.bfloat16)


def _build_patches(density):
    """Per-batch im2col for the 3x3 SAME conv, lane-dense: (B, 10, H*W); row 9 = ones
    (folds the conv1 bias into the conv1 matmul)."""
    B, H, W = density.shape
    x_pad = jnp.pad(density.astype(jnp.float32), ((0, 0), (1, 1), (1, 1)))
    rows = [x_pad[:, kh:kh + H, kw:kw + W].reshape(B, H * W)
            for kh in range(KH) for kw in range(KW)]
    rows.append(jnp.ones((B, H * W), jnp.float32))
    return jnp.stack(rows, axis=1)                                 # (B, 10, H*W)


def _build_window_masks_t(H, W):
    """Per-tap window-sum masks, transposed so the in-kernel contraction is canonical:
    masks_t[pos, k] == 1 iff h1 position `pos` contributes to tap k of the SAME conv2."""
    row_rng = [(0, H - 1), (0, H), (1, H)]
    col_rng = [(0, W - 1), (0, W), (1, W)]
    hh = jnp.arange(H)
    ww = jnp.arange(W)
    cols = []
    for kh in range(KH):
        r0, r1 = row_rng[kh]
        rmask = ((hh >= r0) & (hh < r1)).astype(jnp.float32)
        for kw in range(KW):
            c0, c1 = col_rng[kw]
            cmask = ((ww >= c0) & (ww < c1)).astype(jnp.float32)
            cols.append((rmask[:, None] * cmask[None, :]).reshape(H * W))
    return jnp.stack(cols, axis=1)                                 # (H*W, 9)


# ----------------------------------------------------------------------------- kernel
def _projector_kernel(style_ref, patches_ref, masks_t_ref, wslab_ref, w576_ref,
                      out_ref, *, inv_hw):
    f32 = jnp.float32
    dot = functools.partial(jnp.dot, preferred_element_type=f32)

    # -- unpack the resident bf16 weight slab: 3 tile-aligned loads + cheap value slices
    grp_a = wslab_ref[_GA_R0:_GA_R1, :]
    grp_b = wslab_ref[_GB_R0:_GB_R1, :]
    bias = wslab_ref[_GC_R0:_GC_R1, :].astype(f32)
    ws1 = grp_a[:, 0:32].astype(f32)
    ws2 = grp_a[:, 32:64].astype(f32)
    wf1a = grp_a[:, 64:96].astype(f32)
    wf2 = grp_a[:, 96:128].astype(f32)
    wd = grp_b[:, 0:HIDDEN_HALF].astype(f32)                        # (64, 16)
    wf1b = grp_b[0:HIDDEN_HALF, 32:64].astype(f32)                  # (16, 32)
    wc1t = grp_b[0:CONV1_OUT, 64:64 + N_TAPS + 1].astype(f32)       # (32, 10)
    bs1 = bias[0:1, 0:32]
    bs2 = bias[0:1, 32:64]
    bf1 = bias[0:1, 64:96]
    bf2 = bias[0:1, 96:128]
    bc2 = bias[1:2, 0:64]
    bd = bias[1:2, 64:64 + HIDDEN_HALF]

    # ---- style branch: Linear -> ReLU -> Linear --------------------------------
    s = style_ref[0]                                                # (1, 32) f32
    h = jnp.maximum(dot(s, ws1) + bs1, 0.0)
    style_feat = dot(h, ws2) + bs2                                  # (1, 32)

    # ---- density branch ---------------------------------------------------------
    # conv1 (1->32, 3x3, SAME) as ONE lane-dense matmul; bias folded via the ones row.
    patches = patches_ref[0]                                        # (10, HW)
    h1t = jnp.maximum(dot(wc1t, patches), 0.0)                      # (32, HW)

    # conv2 (32->64, 3x3, SAME) + AdaptiveAvgPool2d(1), fused exactly (pool is linear):
    # per-(channel, tap) window sums, then one all-taps conv2 contraction on the MXU;
    # the tap-diagonal (1, 64) blocks are summed with cheap vreg slices (no scratch).
    p = dot(h1t, masks_t_ref[...])                                  # (32, 9)   [c, k]
    q = dot(p.T, w576_ref[...].astype(f32))                         # (9, 576)  [k', k*64+o]
    pooled = q[0:1, 0:CONV2_OUT]
    for k in range(1, N_TAPS):
        pooled = pooled + q[k:k + 1, k * CONV2_OUT:(k + 1) * CONV2_OUT]
    pooled = pooled * inv_hw + bc2                                  # (1, 64)
    dens_feat = dot(pooled, wd) + bd                                # (1, 16)

    # ---- fusion: Linear(concat) -> ReLU -> Linear ------------------------------
    fused = jnp.maximum(dot(style_feat, wf1a) + dot(dens_feat, wf1b) + bf1, 0.0)
    adain = dot(fused, wf2) + bf2                                   # (1, 32)

    # softplus(x) = max(x,0) + log(1 + exp(-|x|)); applied only to the std lanes,
    # selected by a lane iota so the write stays a single store.
    col = lax.broadcasted_iota(jnp.int32, adain.shape, 1)
    softp = jnp.maximum(adain, 0.0) + jnp.log(1.0 + jnp.exp(-jnp.abs(adain))) + 1e-5
    out_ref[0] = jnp.where(col >= SPATIAL_DIM, softp, adain).astype(out_ref.dtype)


# ----------------------------------------------------------------------------- wrapper
def density_aware_style_projector(style_embeddings, density_weights, params):
    """style_embeddings: (B, STYLE_DIM) f32; density_weights: (B, H, W) f32.
    Returns (style_mean, style_std), each (B, 1, SPATIAL_DIM)."""
    B, H, W = density_weights.shape
    hw = H * W

    wslab = _pack_weight_slab(params)                               # (112, 128) bf16, resident
    w576 = _pack_conv2_weights(params)                              # (32, 576)  bf16, resident
    patches = _build_patches(density_weights)                       # (B, 10, HW) f32, per-batch
    masks_t = _build_window_masks_t(H, W)                           # (HW, 9)    f32, resident
    style = style_embeddings.astype(jnp.float32)[:, None, :]        # (B, 1, 32)  per-batch

    flops_per_b = (2 * (STYLE_DIM * HIDDEN_DIM + HIDDEN_DIM * HIDDEN_DIM)
                   + 2 * CONV1_OUT * (N_TAPS + 1) * hw
                   + 2 * CONV1_OUT * hw * N_TAPS
                   + 2 * N_TAPS * CONV1_OUT * (N_TAPS * CONV2_OUT)
                   + 2 * CONV2_OUT * HIDDEN_HALF
                   + 2 * (HIDDEN_DIM * HIDDEN_DIM + HIDDEN_HALF * HIDDEN_DIM)
                   + 2 * HIDDEN_DIM * 2 * SPATIAL_DIM)
    bytes_accessed = int(4 * (style.size + patches.size + masks_t.size
                              + B * 2 * SPATIAL_DIM)
                         + 2 * (wslab.size + w576.size))

    kernel = functools.partial(_projector_kernel, inv_hw=1.0 / float(hw))
    adain = pl.pallas_call(
        kernel,
        out_shape=jax.ShapeDtypeStruct((B, 1, 2 * SPATIAL_DIM), jnp.float32),
        grid_spec=pltpu.PrefetchScalarGridSpec(
            num_scalar_prefetch=0,
            grid=(B,),
            in_specs=[
                pl.BlockSpec((1, 1, STYLE_DIM), lambda b: (b, 0, 0)),
                pl.BlockSpec((1, N_TAPS + 1, hw), lambda b: (b, 0, 0)),
                pl.BlockSpec((hw, N_TAPS), lambda b: (0, 0)),            # resident
                pl.BlockSpec((WSLAB_ROWS, WSLAB_LANES), lambda b: (0, 0)),  # resident
                pl.BlockSpec((CONV1_OUT, N_TAPS * CONV2_OUT), lambda b: (0, 0)),  # resident
            ],
            out_specs=pl.BlockSpec((1, 1, 2 * SPATIAL_DIM), lambda b: (b, 0, 0)),
        ),
        compiler_params=pltpu.CompilerParams(
            dimension_semantics=("parallel",),
            vmem_limit_bytes=32 * 1024 * 1024),
        cost_estimate=pl.CostEstimate(flops=B * flops_per_b,
                                      transcendentals=B * 4 * SPATIAL_DIM,
                                      bytes_accessed=bytes_accessed),
    )(style, patches, masks_t, wslab, w576)

    style_mean = adain[:, :, :SPATIAL_DIM]
    style_std = adain[:, :, SPATIAL_DIM:]
    return style_mean, style_std


# ----------------------------------------------------------------------------- params
def init_params(key):
    def xavier(k, fin, fout):
        lim = math.sqrt(6.0 / (fin + fout))
        return jax.random.uniform(k, (fin, fout), jnp.float32, -lim, lim)

    def kaiming_conv(k, cin, cout):
        fan_out = cout * KH * KW
        std = math.sqrt(2.0 / fan_out)
        return jax.random.normal(k, (KH, KW, cin, cout), jnp.float32) * std

    ks = jax.random.split(key, 8)
    p = {}
    p["ws1"] = xavier(ks[0], STYLE_DIM, HIDDEN_DIM)
    p["bs1"] = jnp.zeros((1, HIDDEN_DIM), jnp.float32)
    p["ws2"] = xavier(ks[1], HIDDEN_DIM, HIDDEN_DIM)
    p["bs2"] = jnp.zeros((1, HIDDEN_DIM), jnp.float32)
    p["wc1_4d"] = kaiming_conv(ks[2], 1, CONV1_OUT)                 # (3,3,1,32)  HWIO
    p["bc1"] = jnp.zeros((1, CONV1_OUT), jnp.float32)
    p["wc2_4d"] = kaiming_conv(ks[3], CONV1_OUT, CONV2_OUT)         # (3,3,32,64) HWIO
    p["bc2"] = jnp.zeros((1, CONV2_OUT), jnp.float32)
    p["wd"] = xavier(ks[4], CONV2_OUT, HIDDEN_HALF)
    p["bd"] = jnp.zeros((1, HIDDEN_HALF), jnp.float32)
    p["wf1"] = xavier(ks[5], HIDDEN_DIM + HIDDEN_HALF, HIDDEN_DIM)
    p["bf1"] = jnp.zeros((1, HIDDEN_DIM), jnp.float32)
    p["wf2"] = xavier(ks[6], HIDDEN_DIM, 2 * SPATIAL_DIM)
    p["bf2"] = jnp.zeros((1, 2 * SPATIAL_DIM), jnp.float32)
    return p


# ----------------------------------------------------------------------------- reference
def reference_forward(style, density, params):
    hp = lax.Precision.HIGHEST
    sf = jnp.maximum(jnp.dot(style, params["ws1"], precision=hp) + params["bs1"], 0.0)
    sf = jnp.dot(sf, params["ws2"], precision=hp) + params["bs2"]

    x = density[:, None, :, :]                                      # NCHW
    dn = ("NCHW", "HWIO", "NCHW")
    c1 = lax.conv_general_dilated(x, params["wc1_4d"], (1, 1), "SAME",
                                  dimension_numbers=dn, precision=hp)
    c1 = jnp.maximum(c1 + params["bc1"].reshape(1, CONV1_OUT, 1, 1), 0.0)
    c2 = lax.conv_general_dilated(c1, params["wc2_4d"], (1, 1), "SAME",
                                  dimension_numbers=dn, precision=hp)
    c2 = c2 + params["bc2"].reshape(1, CONV2_OUT, 1, 1)
    pooled = jnp.mean(c2, axis=(2, 3))                              # (B, 64)
    df = jnp.dot(pooled, params["wd"], precision=hp) + params["bd"]

    comb = jnp.concatenate([sf, df], axis=1)
    f1 = jnp.maximum(jnp.dot(comb, params["wf1"], precision=hp) + params["bf1"], 0.0)
    adain = jnp.dot(f1, params["wf2"], precision=hp) + params["bf2"]
    mean_p = adain[:, :SPATIAL_DIM]
    std_p = jax.nn.softplus(adain[:, SPATIAL_DIM:]) + 1e-5
    return mean_p[:, None, :], std_p[:, None, :]


# ----------------------------------------------------------------------------- main
if __name__ == "__main__":
    key = jax.random.PRNGKey(0)
    k_param, k_style, k_dens = jax.random.split(key, 3)

    B, H, W = 2, 8, 8
    params = init_params(k_param)
    style = jax.random.normal(k_style, (B, STYLE_DIM), jnp.float32)
    density = jax.random.uniform(k_dens, (B, H, W), jnp.float32)

    style_mean, style_std = density_aware_style_projector(style, density, params)
    style_mean = jax.block_until_ready(style_mean)
    style_std = jax.block_until_ready(style_std)

    ref_mean, ref_std = reference_forward(style, density, params)
    assert style_mean.shape == (B, 1, SPATIAL_DIM) and style_std.shape == (B, 1, SPATIAL_DIM)
    # 1e-2 tolerance covers bf16 weight quantization + default-precision MXU accumulation
    # vs. the f32 / Precision.HIGHEST reference (typical observed error is ~1e-3).
    assert jnp.allclose(style_mean, ref_mean, rtol=1e-2, atol=1e-2)
    assert jnp.allclose(style_std, ref_std, rtol=1e-2, atol=1e-2)

    print("KERNEL_OK")
</pallas_src>

<mosaic_0001>
module attributes {stable_mosaic.version = 11 : i64} {
  func.func @_projector_kernel(%arg0: i32, %arg1: memref<1x1x32xf32, #tpu.memory_space<vmem>>, %arg2: memref<1x10x64xf32, #tpu.memory_space<vmem>>, %arg3: memref<64x9xf32, #tpu.memory_space<vmem>>, %arg4: memref<112x128xbf16, #tpu.memory_space<vmem>>, %arg5: memref<32x576xbf16, #tpu.memory_space<vmem>>, %arg6: memref<1x1x32xf32, #tpu.memory_space<vmem>>) attributes {dimension_semantics = [#tpu.dimension_semantics<parallel>], iteration_bounds = array<i64: 2>, scalar_prefetch = 0 : i64, scratch_operands = 0 : i64, tpu.core_type = #tpu.core_type<tc>, window_params = [{transform_indices = @transform_0, window_bounds = array<i64: 1, 1, 32>}, {transform_indices = @transform_1, window_bounds = array<i64: 1, 10, 64>}, {pipeline_mode = #tpu.pipeline_mode<synchronous>, transform_indices = @transform_2, window_bounds = array<i64: 64, 9>}, {pipeline_mode = #tpu.pipeline_mode<synchronous>, transform_indices = @transform_3, window_bounds = array<i64: 112, 128>}, {pipeline_mode = #tpu.pipeline_mode<synchronous>, transform_indices = @transform_4, window_bounds = array<i64: 32, 576>}, {transform_indices = @transform_5, window_bounds = array<i64: 1, 1, 32>}]} {
    %c0 = arith.constant 0 : index
    %c0_0 = arith.constant 0 : index
    %0 = vector.load %arg4[%c0, %c0_0] : memref<112x128xbf16, #tpu.memory_space<vmem>>, vector<32x128xbf16>
    %c32 = arith.constant 32 : index
    %c0_1 = arith.constant 0 : index
    %1 = vector.load %arg4[%c32, %c0_1] : memref<112x128xbf16, #tpu.memory_space<vmem>>, vector<64x128xbf16>
    %c96 = arith.constant 96 : index
    %c0_2 = arith.constant 0 : index
    %2 = vector.load %arg4[%c96, %c0_2] : memref<112x128xbf16, #tpu.memory_space<vmem>>, vector<16x128xbf16>
    %3 = arith.extf %2 : vector<16x128xbf16> to vector<16x128xf32>
    %4 = vector.extract_strided_slice %0 {offsets = [0, 0], sizes = [32, 32], strides = [1, 1]} : vector<32x128xbf16> to vector<32x32xbf16>
    %5 = arith.extf %4 : vector<32x32xbf16> to vector<32x32xf32>
    %6 = vector.extract_strided_slice %0 {offsets = [0, 32], sizes = [32, 32], strides = [1, 1]} : vector<32x128xbf16> to vector<32x32xbf16>
    %7 = arith.extf %6 : vector<32x32xbf16> to vector<32x32xf32>
    %8 = vector.extract_strided_slice %0 {offsets = [0, 64], sizes = [32, 32], strides = [1, 1]} : vector<32x128xbf16> to vector<32x32xbf16>
    %9 = arith.extf %8 : vector<32x32xbf16> to vector<32x32xf32>
    %10 = vector.extract_strided_slice %0 {offsets = [0, 96], sizes = [32, 32], strides = [1, 1]} : vector<32x128xbf16> to vector<32x32xbf16>
    %11 = arith.extf %10 : vector<32x32xbf16> to vector<32x32xf32>
    %12 = vector.extract_strided_slice %1 {offsets = [0, 0], sizes = [64, 16], strides = [1, 1]} : vector<64x128xbf16> to vector<64x16xbf16>
    %13 = arith.extf %12 : vector<64x16xbf16> to vector<64x16xf32>
    %14 = vector.extract_strided_slice %1 {offsets = [0, 32], sizes = [16, 32], strides = [1, 1]} : vector<64x128xbf16> to vector<16x32xbf16>
    %15 = arith.extf %14 : vector<16x32xbf16> to vector<16x32xf32>
    %16 = vector.extract_strided_slice %1 {offsets = [0, 64], sizes = [32, 10], strides = [1, 1]} : vector<64x128xbf16> to vector<32x10xbf16>
    %17 = arith.extf %16 : vector<32x10xbf16> to vector<32x10xf32>
    %18 = vector.extract_strided_slice %3 {offsets = [0, 0], sizes = [1, 32], strides = [1, 1]} : vector<16x128xf32> to vector<1x32xf32>
    %19 = vector.extract_strided_slice %3 {offsets = [0, 32], sizes = [1, 32], strides = [1, 1]} : vector<16x128xf32> to vector<1x32xf32>
    %20 = vector.extract_strided_slice %3 {offsets = [0, 64], sizes = [1, 32], strides = [1, 1]} : vector<16x128xf32> to vector<1x32xf32>
    %21 = vector.extract_strided_slice %3 {offsets = [0, 96], sizes = [1, 32], strides = [1, 1]} : vector<16x128xf32> to vector<1x32xf32>
    %22 = vector.extract_strided_slice %3 {offsets = [1, 0], sizes = [1, 64], strides = [1, 1]} : vector<16x128xf32> to vector<1x64xf32>
    %23 = vector.extract_strided_slice %3 {offsets = [1, 64], sizes = [1, 16], strides = [1, 1]} : vector<16x128xf32> to vector<1x16xf32>
    %c0_3 = arith.constant 0 : index
    %c0_4 = arith.constant 0 : index
    %c0_5 = arith.constant 0 : index
    %24 = vector.load %arg1[%c0_3, %c0_4, %c0_5] : memref<1x1x32xf32, #tpu.memory_space<vmem>>, vector<1x1x32xf32>
    %25 = vector.shape_cast %24 : vector<1x1x32xf32> to vector<1x32xf32>
    %cst = arith.constant dense<0.000000e+00> : vector<1x32xf32>
    %26 = tpu.matmul %25, %5, %cst {dimension_numbers = #tpu.dot_dimension_numbers<[1], [0], [0], [1], [0, 0, 1, 1], [], []>} : vector<1x32xf32>, vector<32x32xf32>, vector<1x32xf32> -> vector<1x32xf32>
    %27 = arith.addf %26, %18 : vector<1x32xf32>
    %cst_6 = arith.constant 0.000000e+00 : f32
    %28 = vector.broadcast %cst_6 : f32 to vector<1x32xf32>
    %29 = arith.maximumf %27, %28 : vector<1x32xf32>
    %cst_7 = arith.constant dense<0.000000e+00> : vector<1x32xf32>
    %30 = tpu.matmul %29, %7, %cst_7 {dimension_numbers = #tpu.dot_dimension_numbers<[1], [0], [0], [1], [0, 0, 1, 1], [], []>} : vector<1x32xf32>, vector<32x32xf32>, vector<1x32xf32> -> vector<1x32xf32>
    %31 = arith.addf %30, %19 : vector<1x32xf32>
    %c0_8 = arith.constant 0 : index
    %c0_9 = arith.constant 0 : index
    %c0_10 = arith.constant 0 : index
    %32 = vector.load %arg2[%c0_8, %c0_9, %c0_10] : memref<1x10x64xf32, #tpu.memory_space<vmem>>, vector<1x10x64xf32>
    %33 = vector.shape_cast %32 : vector<1x10x64xf32> to vector<10x64xf32>
    %cst_11 = arith.constant dense<0.000000e+00> : vector<32x64xf32>
    %34 = tpu.matmul %17, %33, %cst_11 {dimension_numbers = #tpu.dot_dimension_numbers<[1], [0], [0], [1], [0, 0, 1, 1], [], []>} : vector<32x10xf32>, vector<10x64xf32>, vector<32x64xf32> -> vector<32x64xf32>
    %cst_12 = arith.constant 0.000000e+00 : f32
    %35 = vector.broadcast %cst_12 : f32 to vector<32x64xf32>
    %36 = arith.maximumf %34, %35 : vector<32x64xf32>
    %c0_13 = arith.constant 0 : index
    %c0_14 = arith.constant 0 : index
    %37 = vector.load %arg3[%c0_13, %c0_14] : memref<64x9xf32, #tpu.memory_space<vmem>>, vector<64x9xf32>
    %cst_15 = arith.constant dense<0.000000e+00> : vector<32x9xf32>
    %38 = tpu.matmul %36, %37, %cst_15 {dimension_numbers = #tpu.dot_dimension_numbers<[1], [0], [0], [1], [0, 0, 1, 1], [], []>} : vector<32x64xf32>, vector<64x9xf32>, vector<32x9xf32> -> vector<32x9xf32>
    %39 = tpu.transpose %38, [1, 0] : vector<32x9xf32> -> vector<9x32xf32>
    %c0_16 = arith.constant 0 : index
    %c0_17 = arith.constant 0 : index
    %40 = vector.load %arg5[%c0_16, %c0_17] : memref<32x576xbf16, #tpu.memory_space<vmem>>, vector<32x576xbf16>
    %41 = arith.extf %40 : vector<32x576xbf16> to vector<32x576xf32>
    %cst_18 = arith.constant dense<0.000000e+00> : vector<9x576xf32>
    %42 = tpu.matmul %39, %41, %cst_18 {dimension_numbers = #tpu.dot_dimension_numbers<[1], [0], [0], [1], [0, 0, 1, 1], [], []>} : vector<9x32xf32>, vector<32x576xf32>, vector<9x576xf32> -> vector<9x576xf32>
    %43 = vector.extract_strided_slice %42 {offsets = [0, 0], sizes = [1, 64], strides = [1, 1]} : vector<9x576xf32> to vector<1x64xf32>
    %44 = vector.extract_strided_slice %42 {offsets = [1, 64], sizes = [1, 64], strides = [1, 1]} : vector<9x576xf32> to vector<1x64xf32>
    %45 = arith.addf %43, %44 : vector<1x64xf32>
    %46 = vector.extract_strided_slice %42 {offsets = [2, 128], sizes = [1, 64], strides = [1, 1]} : vector<9x576xf32> to vector<1x64xf32>
    %47 = arith.addf %45, %46 : vector<1x64xf32>
    %48 = vector.extract_strided_slice %42 {offsets = [3, 192], sizes = [1, 64], strides = [1, 1]} : vector<9x576xf32> to vector<1x64xf32>
    %49 = arith.addf %47, %48 : vector<1x64xf32>
    %50 = vector.extract_strided_slice %42 {offsets = [4, 256], sizes = [1, 64], strides = [1, 1]} : vector<9x576xf32> to vector<1x64xf32>
    %51 = arith.addf %49, %50 : vector<1x64xf32>
    %52 = vector.extract_strided_slice %42 {offsets = [5, 320], sizes = [1, 64], strides = [1, 1]} : vector<9x576xf32> to vector<1x64xf32>
    %53 = arith.addf %51, %52 : vector<1x64xf32>
    %54 = vector.extract_strided_slice %42 {offsets = [6, 384], sizes = [1, 64], strides = [1, 1]} : vector<9x576xf32> to vector<1x64xf32>
    %55 = arith.addf %53, %54 : vector<1x64xf32>
    %56 = vector.extract_strided_slice %42 {offsets = [7, 448], sizes = [1, 64], strides = [1, 1]} : vector<9x576xf32> to vector<1x64xf32>
    %57 = arith.addf %55, %56 : vector<1x64xf32>
    %58 = vector.extract_strided_slice %42 {offsets = [8, 512], sizes = [1, 64], strides = [1, 1]} : vector<9x576xf32> to vector<1x64xf32>
    %59 = arith.addf %57, %58 : vector<1x64xf32>
    %cst_19 = arith.constant 1.562500e-02 : f32
    %60 = vector.broadcast %cst_19 : f32 to vector<1x64xf32>
    %61 = arith.mulf %59, %60 : vector<1x64xf32>
    %62 = arith.addf %61, %22 : vector<1x64xf32>
    %cst_20 = arith.constant dense<0.000000e+00> : vector<1x16xf32>
    %63 = tpu.matmul %62, %13, %cst_20 {dimension_numbers = #tpu.dot_dimension_numbers<[1], [0], [0], [1], [0, 0, 1, 1], [], []>} : vector<1x64xf32>, vector<64x16xf32>, vector<1x16xf32> -> vector<1x16xf32>
    %64 = arith.addf %63, %23 : vector<1x16xf32>
    %cst_21 = arith.constant dense<0.000000e+00> : vector<1x32xf32>
    %65 = tpu.matmul %31, %9, %cst_21 {dimension_numbers = #tpu.dot_dimension_numbers<[1], [0], [0], [1], [0, 0, 1, 1], [], []>} : vector<1x32xf32>, vector<32x32xf32>, vector<1x32xf32> -> vector<1x32xf32>
    %cst_22 = arith.constant dense<0.000000e+00> : vector<1x32xf32>
    %66 = tpu.matmul %64, %15, %cst_22 {dimension_numbers = #tpu.dot_dimension_numbers<[1], [0], [0], [1], [0, 0, 1, 1], [], []>} : vector<1x16xf32>, vector<16x32xf32>, vector<1x32xf32> -> vector<1x32xf32>
    %67 = arith.addf %65, %66 : vector<1x32xf32>
    %68 = arith.addf %67, %20 : vector<1x32xf32>
    %cst_23 = arith.constant 0.000000e+00 : f32
    %69 = vector.broadcast %cst_23 : f32 to vector<1x32xf32>
    %70 = arith.maximumf %68, %69 : vector<1x32xf32>
    %cst_24 = arith.constant dense<0.000000e+00> : vector<1x32xf32>
    %71 = tpu.matmul %70, %11, %cst_24 {dimension_numbers = #tpu.dot_dimension_numbers<[1], [0], [0], [1], [0, 0, 1, 1], [], []>} : vector<1x32xf32>, vector<32x32xf32>, vector<1x32xf32> -> vector<1x32xf32>
    %72 = arith.addf %71, %21 : vector<1x32xf32>
    %73 = tpu.iota {dimensions = array<i32: 1>} : vector<1x32xi32>
    %cst_25 = arith.constant 0.000000e+00 : f32
    %74 = vector.broadcast %cst_25 : f32 to vector<1x32xf32>
    %75 = arith.maximumf %72, %74 : vector<1x32xf32>
    %76 = math.absf %72 : vector<1x32xf32>
    %cst_26 = arith.constant 0.000000e+00 : f32
    %77 = vector.broadcast %cst_26 : f32 to vector<1x32xf32>
    %78 = arith.subf %77, %76 : vector<1x32xf32>
    %79 = math.exp %78 : vector<1x32xf32>
    %cst_27 = arith.constant 1.000000e+00 : f32
    %80 = vector.broadcast %cst_27 : f32 to vector<1x32xf32>
    %81 = arith.addf %80, %79 : vector<1x32xf32>
    %82 = math.log %81 : vector<1x32xf32>
    %83 = arith.addf %75, %82 : vector<1x32xf32>
    %cst_28 = arith.constant 9.99999974E-6 : f32
    %84 = vector.broadcast %cst_28 : f32 to vector<1x32xf32>
    %85 = arith.addf %83, %84 : vector<1x32xf32>
    %c16_i32 = arith.constant 16 : i32
    %86 = vector.broadcast %c16_i32 : i32 to vector<1x32xi32>
    %87 = arith.cmpi sge, %73, %86 : vector<1x32xi32>
    %88 = arith.select %87, %85, %72 : vector<1x32xi1>, vector<1x32xf32>
    %c0_29 = arith.constant 0 : index
    %c0_30 = arith.constant 0 : index
    %c0_31 = arith.constant 0 : index
    %89 = vector.load %arg6[%c0_29, %c0_30, %c0_31] : memref<1x1x32xf32, #tpu.memory_space<vmem>>, vector<1x1x32xf32>
    %90 = vector.shape_cast %89 : vector<1x1x32xf32> to vector<1x32xf32>
    %91 = vector.shape_cast %88 : vector<1x32xf32> to vector<1x1x32xf32>
    tpu.vector_store %arg6[%c0_29, %c0_30, %c0_31], %91 {strides = array<i32>} : memref<1x1x32xf32, #tpu.memory_space<vmem>>, vector<1x1x32xf32>,
    return
  }
  func.func @transform_0(%arg0: i32) -> (i32, i32, i32) {
    %c0_i32 = arith.constant 0 : i32
    %c0_i32_0 = arith.constant 0 : i32
    %c0_i32_1 = arith.constant 0 : i32
    return %arg0, %c0_i32, %c0_i32_0 : i32, i32, i32
  }
  func.func @transform_1(%arg0: i32) -> (i32, i32, i32) {
    %c0_i32 = arith.constant 0 : i32
    %c0_i32_0 = arith.constant 0 : i32
    %c0_i32_1 = arith.constant 0 : i32
    return %arg0, %c0_i32, %c0_i32_0 : i32, i32, i32
  }
  func.func @transform_2(%arg0: i32) -> (i32, i32) {
    %c0_i32 = arith.constant 0 : i32
    %c0_i32_0 = arith.constant 0 : i32
    %c0_i32_1 = arith.constant 0 : i32
    return %c0_i32, %c0_i32_0 : i32, i32
  }
  func.func @transform_3(%arg0: i32) -> (i32, i32) {
    %c0_i32 = arith.constant 0 : i32
    %c0_i32_0 = arith.constant 0 : i32
    %c0_i32_1 = arith.constant 0 : i32
    return %c0_i32, %c0_i32_0 : i32, i32
  }
  func.func @transform_4(%arg0: i32) -> (i32, i32) {
    %c0_i32 = arith.constant 0 : i32
    %c0_i32_0 = arith.constant 0 : i32
    %c0_i32_1 = arith.constant 0 : i32
    return %c0_i32, %c0_i32_0 : i32, i32
  }
  func.func @transform_5(%arg0: i32) -> (i32, i32, i32) {
    %c0_i32 = arith.constant 0 : i32
    %c0_i32_0 = arith.constant 0 : i32
    %c0_i32_1 = arith.constant 0 : i32
    return %arg0, %c0_i32, %c0_i32_0 : i32, i32, i32
  }
}

</mosaic_0001>

<bundles_post_ra>
// kernel: tpu_custom_call.1
= control target key start
LH: loop header
LB: loop body
LE: loop exit
PB: predicated region body
PF: predicated region fallthrough
CT: control target
= control target key end

     0   :  { %10 = vsyncpa [#allocation3], 0  ;;  %s2244_s0 = inlined_call_operand.vmem [shape: f32[2,1,32], index: 0, kind: input, shape index: {}]   ;;  %s2245_s1 = inlined_call_operand.vmem [shape: f32[2,10,64], index: 1, kind: input, shape index: {}]   ;;  %s2246_s2 = inlined_call_operand.vmem [shape: f32[64,9], index: 2, kind: input, shape index: {}]   ;;  %s2247_s3 = inlined_call_operand.vmem [shape: bf16[112,128], index: 3, kind: input, shape index: {}]   ;;  %s2248_s4 = inlined_call_operand.vmem [shape: bf16[32,576], index: 4, kind: input, shape index: {}]   ;;  %s2249_s5 = inlined_call_operand.hbm [shape: f32[2,1,32], index: 5, kind: output, shape index: {}]  }
   0x1   :  { %12 = vsyncpa [#allocation3 + $0x1], 0  ;;  %s1950_s18 = smov 0   ;;  %s1952_s19 = smov 0  }
   0x2   :  { %s1954_s20 = smov 0   ;;  %s1956_s21 = smov 0  }
   0x3 LB: > { %s1971_s22 = sadd.s32 4294967295, %s1910_s21   ;;  %s1412_s23 = sadd.s32 4294967294, %s1910_s21   ;;  %s1910_s21 = sphi %s1956_s21, %s2257_s21   ;;  %s1906_s20 = sphi %s1954_s20, %s2256_s20   ;;  %s1902_s19 = sphi %s1952_s19, %s2255_s19   ;;  %s1898_s18 = sphi %s1950_s18, %s2254_s18  }
   0x4   : > { %s1975_s24 = sadd.s32 1, %s1910_s21   ;;  %s140_s25 = sadd.s32 1, %s1906_s20 }
   0x5   : > { %s137_s26 = ssub.s32 %s1910_s21, %s1975_s24  ;;  %p150_p0 = scmp.ne.s32.totalorder %s1906_s20, %s1902_s19 }
   0x6   : > { %p138_p1 = scmp.eq.s32.totalorder %s137_s26, 0  ;;  %p151_p2 = scmp.eq.s32.totalorder %s1971_s22, 1 }
   0x7   : > { %p156_p3 = scmp.ne.s32.totalorder %s1902_s19, %s1898_s18  ;;  %p157_p4 = scmp.eq.s32.totalorder %s1412_s23, 1 }
   0x8   : > { %s1986_s27 = scalar_select %p138_p1, %s1906_s20, %s140_s25  }
   0x9   : > { %p1988_p5 = por %p151_p2, %p150_p0  ;;  %p1992_p6 = por %p157_p4, %p156_p3 }
   0xa   : > { %p1415_p7 = scmp.ge.s32.totalorder %s1910_s21, 1  ;;  %p198_p8 = scmp.lt.s32.totalorder %s1910_s21, 3 }
   0xc   : > { %p199_p9 = pnand %p1415_p7, %p198_p8 }
   0xd   : > { %v2001_v0 = vld [vmem:[%s2247_s3] sm:$0xff] (!%p199_p9)   ;;  %v1467_v1 = vld [vmem:[%s2247_s3 + $0x8] sm:$0xff] (!%p199_p9)   ;;  %p228_p10 = scmp.lt.s32.totalorder (!%p199_p9), %s1971_s22, 1  ;;  %v1912_v2 = vmov (!%p199_p9), 0.0|0.0   ;;  %vm1913_vm0 = vmmov (!%p199_p9), 0   ;;  %v1914_v7 = vmov (!%p199_p9), 0.0  }
   0xe   : > { %202 = sbr.rel (%p199_p9) target bundleno = 1857 (0x741), region = 40  ;;  %1641 = vmatprep.subr.bf16.mxu0 (!%p199_p9), %v1912_v2  ;;  %v1445_v3 = vunpack.c.l.bf16 (!%p199_p9), %v2001_v0  ;;  %v1446_v4 = vunpack.c.h.bf16 (!%p199_p9), %v2001_v0  ;;  %v1449_v5 = vunpack.c.l.bf16 (!%p199_p9), %v1467_v1  ;;  %v1450_v6 = vunpack.c.h.bf16 (!%p199_p9), %v1467_v1  ;;  %1536 = vmatprep.mubr.msk.f32.mxu0 (!%p199_p9), %vm1913_vm0, %v1914_v7  ;;  %v2015_v8 = vld [vmem:[%s2247_s3 + $0x10] sm:$0xff] (!%p199_p9)   ;;  %v2020_v9 = vld [vmem:[%s2247_s3 + $0x18] sm:$0xff] (!%p199_p9)   ;;  %s1915_s17 = smov (!%p199_p9), 96   ;;  %v547_v35 = vld [vmem:[%s2246_s2] sm:$0xff] (!%p199_p9) }
   0xf   : > { %1643 = vmatpush3.bf16.msra.mxu0 (!%p199_p9), %v2001_v0  ;;  %v1453_v10 = vunpack.c.l.bf16 (!%p199_p9), %v2015_v8  ;;  %v1454_v11 = vunpack.c.h.bf16 (!%p199_p9), %v2015_v8  ;;  %v1457_v12 = vunpack.c.l.bf16 (!%p199_p9), %v2020_v9  ;;  %1647 = vmatprep.subr.bf16.mxu1 (!%p199_p9), %v1912_v2  ;;  %v1458_v14 = vunpack.c.h.bf16 (!%p199_p9), %v2020_v9  ;;  %s1916_s23 = smov (!%p199_p9), 64   ;;  %v248_v31 = vld [vmem:[%s2247_s3 + $0x30] sm:$0xf] (!%p199_p9)  ;;  %v548_v36 = vld [vmem:[%s2246_s2 + $0x8] sm:$0xff] (!%p199_p9)  ;;  %v550_v44 = vld [vmem:[%s2246_s2 + $0x18] sm:$0xff] (!%p199_p9)  ;;  %s1439_s7 = sshll.u32 (!%p199_p9), %s1971_s22, 4 }
  0x10   : > { %1644 = vmatprep.subr.bf16.mxu0 (!%p199_p9), %v1912_v2  ;;  %v2033_v13 = vpack.i.bf16 (!%p199_p9), %v1446_v4, %v1445_v3  ;;  %1547 = vmatprep.mubr.msk.f32.mxu1 (!%p199_p9), %vm1913_vm0, %v1914_v7  ;;  %v2045_v16 = vpack.i.bf16 (!%p199_p9), %v1450_v6, %v1449_v5  ;;  %vm263_vm1 = vcmask (!%p199_p9), 261120   ;;  %vm454_vm2 = vcmask (!%p199_p9), 1041408   ;;  %v549_v43 = vld [vmem:[%s2246_s2 + $0x10] sm:$0xff] (!%p199_p9)  ;;  %v551_v49 = vld [vmem:[%s2246_s2 + $0x20] sm:$0xff] (!%p199_p9)  ;;  %v552_v50 = vld [vmem:[%s2246_s2 + $0x28] sm:$0xff] (!%p199_p9)  ;;  %s2202_s12 = scalar_lea.hbm (!%p199_p9), %s2249_s5, %s1439_s7 }
  0x11   : > { %v2041_v15 = vpack.i.bf16 (!%p199_p9), %v1454_v11, %v1453_v10  ;;  %v1799_v18 = vpack.i.bf16 (!%p199_p9), %v1458_v14, %v1457_v12  ;;  %vm1917_vm3 = vmmov (!%p199_p9), 1   ;;  %v2067_v32 = vunpack.c.l.bf16 (!%p199_p9), %v248_v31  ;;  %v553_v52 = vld [vmem:[%s2246_s2 + $0x30] sm:$0xff] (!%p199_p9)  ;;  %v554_v53 = vld [vmem:[%s2246_s2 + $0x38] sm:$0xff] (!%p199_p9)  ;;  %v1832_v10 = vld [vmem:[%s2248_s4 + $0x2c] ss:$20 sps:$4 sm:$0xff] (!%p199_p9)  }
  0x12   : > { %1785 = vrot.lane.b32.xlu0 (!%p199_p9), %v2033_v13, %s1915_s17  ;;  %vm2058_vm4 = vmpackc.low (!%p199_p9), %vm454_vm2, %vm1917_vm3  ;;  %vm445_vm5 = vcmask (!%p199_p9), 80896   ;;  %v1659_v42 = vpack.c.bf16 (!%p199_p9), %v548_v36, %v547_v35  ;;  %v1663_v47 = vpack.c.bf16 (!%p199_p9), %v550_v44, %v549_v43  ;;  %v1667_v51 = vpack.c.bf16 (!%p199_p9), %v552_v50, %v551_v49  ;;  %v1829_v5 = vld [vmem:[%s2248_s4 + $0x4] ss:$20 sps:$4 sm:$0xff] (!%p199_p9)   ;;  %v1831_v6 = vld [vmem:[%s2248_s4] ss:$20 sps:$4 sm:$0xff] (!%p199_p9)  }
  0x13   : > { %1646 = vmatpush3.bf16.msra.mxu0 (!%p199_p9), %v1467_v1  ;;  %1795 = vrot.lane.b32.xlu1 (!%p199_p9), %v2041_v15, %s1916_s23  ;;  %v1671_v54 = vpack.c.bf16 (!%p199_p9), %v554_v53, %v553_v52  ;;  %vm555_vm6 = vcmask (!%p199_p9), 523264   ;;  %v1835_v11 = vld [vmem:[%s2248_s4 + $0x10] ss:$20 sps:$4 sm:$0xff] (!%p199_p9)   ;;  %v1834_v12 = vld [vmem:[%s2248_s4 + $0x28] ss:$20 sps:$4 sm:$0xff] (!%p199_p9)   ;;  %vm1067_vm7 = vcmask (!%p199_p9), 130048  }
  0x14   : > { %1676 = vmatprep.subr.bf16.mxu0 (!%p199_p9), %v1829_v5  ;;  %v1836_v14 = vld [vmem:[%s2248_s4 + $0xc] ss:$20 sps:$4 sm:$0xff] (!%p199_p9)   ;;  %vm1333_vm9 = vcmask (!%p199_p9), 253952  }
  0x15   : > { %s229_s13 = scalar_select %p228_p10, %s1971_s22, 1  ;;  %v1470_v30 = vld [vmem:[%s2247_s3 + $0x20] sm:$0xff]   ;;  %v1471_v35 = vld [vmem:[%s2247_s3 + $0x28] sm:$0xff]  }
  0x16   : > { %1790 = vrot.lane.b32.xlu0 %v2045_v16, %s1915_s17  ;;  %s1919_s22 = smov [#allocation2]  }
  0x17   : > { %s230_s16 = scalar_lea.vmem %s2244_s0, %s229_s13  ;;  %1800 = vrot.lane.b32.xlu1 %v1799_v18, %s1916_s23  ;;  %s1442_s25 = sshll.u32 %s229_s13, 4 }
  0x18   : > { %v262_v17 = vld [vmem:[%s230_s16] sm:$0x1]  ;;  %s235_s6 = scalar_lea.vmem %s2245_s1, %s1442_s25  ;;  %s1852_s15 = sshll.u32 %s1919_s22, 4  ;;  %s1853_s15 = int_to_ptr.vmem [resolvable:$false] %s1852_s15 }
  0x19   : > { %1537 = vmatmul.mubr.msk.f32.vlgmr.msra.gmra.mrb[0].mxu0 %vm263_vm1, %v262_v17  ;;  %v431_v23 = vld [vmem:[%s235_s6] sm:$0xff]  ;;  %v432_v24 = vld [vmem:[%s235_s6 + $0x8] sm:$0x3]  ;;  %s1854_s16 = scalar_lea.vmem %s1853_s15, 32 }
  0x1a   : > { %787 = vmatprep.mubr.f32.mxu0 %v1914_v7  ;;  %v1653_v28 = vpack.c.bf16 %v432_v24, %v431_v23  ;;  %1678 = vmatpush1.bf16.msra.mxu0 %v1831_v6  ;;  %v1840_v23 = vld [vmem:[%s2248_s4 + $0x34] ss:$20 sps:$4 sm:$0xff]  }
  0x1b   : > { %1680 = vmatprep.subr.bf16.mxu0 %v1832_v10 }
  0x1e   : > { %1682 = vmatpush1.bf16.msra.mxu0 %v1834_v12 }
  0x1f   : > { %1684 = vmatprep.subr.bf16.mxu0 %v1836_v14 }
  0x84   : > { %v1786_v19 = vpop.permute.xlu0 %1785 }
  0x85   : > { %v1788_v20 = vunpack.i.h.bf16 %v1786_v19  ;;  %v1787_v21 = vunpack.i.l.bf16 %v1786_v19  ;;  %v1796_v33 = vpop.permute.xlu1 %1795  ;;  %v1839_v19 = vld [vmem:[%s2248_s4 + $0x38] ss:$20 sps:$4 sm:$0xff]  }
  0x86   : > { %v1797_v39 = vunpack.i.l.bf16 %v1796_v33  ;;  %v1798_v45 = vunpack.i.h.bf16 %v1796_v33 }
  0x87   : > { %v1648_v22 = vpack.c.bf16 %v1788_v20, %v1787_v21 }
  0x88   : > { %v1791_v25 = vpop.permute.xlu0 %1790 }
  0x89   : > { %v1793_v26 = vunpack.i.h.bf16 %v1791_v25  ;;  %v1792_v27 = vunpack.i.l.bf16 %v1791_v25  ;;  %1649 = vmatpush3.bf16.msra.mxu1 %v1648_v22  ;;  %v1801_v41 = vpop.permute.xlu1 %1800  ;;  %v1838_v22 = vld [vmem:[%s2248_s4 + $0x8] ss:$20 sps:$4 sm:$0xff]   ;;  %v1842_v25 = vld [vmem:[%s2248_s4 + $0x30] ss:$20 sps:$4 sm:$0xff]  }
  0x8a   : > { %1650 = vmatprep.subr.bf16.mxu1 %v1912_v2  ;;  %v1802_v46 = vunpack.i.l.bf16 %v1801_v41  ;;  %v1803_v48 = vunpack.i.h.bf16 %v1801_v41 }
  0x8b   : > { %v1651_v29 = vpack.c.bf16 %v1793_v26, %v1792_v27 }
  0x8d   : > { %1652 = vmatpush3.bf16.msra.mxu1 %v1651_v29 }
  0x8e   : > { %1655 = vmatprep.subr.msk.bf16.mxu1 %vm2058_vm4, %v1653_v28 }
  0xec   : > { %v333_v34 = vpop.f32.mrb[0].mxu0 }
  0xed   : > { %v334_v37 = vadd.f32 %v333_v34, %v2067_v32  ;;  %v1538_v38 = vpop.f32.mrb[1].mxu0 }
  0xef   : > { %v337_v40 = vmax.f32 %v334_v37, 0.0 }
  0xf1   : > { %1548 = vmatmul.mubr.msk.f32.vlgmr.msra.gmra.mrb[0].mxu1 %vm263_vm1, %v337_v40 }
  0xf2   : > { %1658 = vmatpush3.bf16.msk.msra.mxu1 %vm2058_vm4, %v1653_v28  ;;  %1554 = vmatprep.mubr.msk.f32.mxu1 %vm445_vm5, %v1797_v39 }
  0xf3   : > { %1660 = vmatprep.subr.bf16.mxu1 %v1659_v42 }
  0xf5   : > { %1555 = vmatmul.mubr.msk.f32.vlgmr.msra.gmra.mrb[2].mxu1 %vm445_vm5, %v1798_v45 }
  0xf6   : > { %1557 = vmatprep.mubr.msk.f32.mxu1 %vm445_vm5, %v1802_v46  ;;  %1662 = vmatpush3.bf16.msra.mxu1 %v1659_v42  ;;  %v982_v42 = vrot.slane %v2067_v32, 1 }
  0xf7   : > { %1664 = vmatprep.subr.bf16.mxu1 %v1663_v47 }
  0xf8   : > { %v1809_v43 = vpack.i.bf16 %v1445_v3, %v982_v42 }
  0xf9   : > { %1558 = vmatmul.mubr.msk.f32.gmra.mrb[4].mxu1 %vm445_vm5, %v1803_v48 }
  0xfa   : > { %1666 = vmatpush3.bf16.msra.mxu1 %v1663_v47 }
  0xfb   : > { %1668 = vmatprep.subr.bf16.mxu1 %v1667_v51 }
  0xfe   : > { %1670 = vmatpush3.bf16.msra.mxu1 %v1667_v51 }
  0xff   : > { %1672 = vmatprep.subr.bf16.mxu1 %v1671_v54 }
 0x102   : > { %1674 = vmatpush3.bf16.msra.mxu1 %v1671_v54 }
 0x103   : > { %1692 = vmatprep.subr.bf16.mxu1 %v1835_v11 }
 0x1c4   : > { %v2101_v55 = vpop.f32.mrb[0].mxu1 }
 0x1c5   : > { %v1549_v56 = vpop.f32.mrb[1].mxu1 }
 0x1c8   : > { %v1556_v57 = vpop.f32.mrb[2].mxu1 }
 0x1c9   : > { %v524_v58 = vpop.f32.mrb[3].mxu1  ;;  %v544_v60 = vmax.f32 %v1556_v57, 0.0 }
 0x1ca   : > { %v543_v59 = vmax.f32 %v524_v58, 0.0 }
 0x1cc   : > { %v1559_v61 = vpop.f32.mrb[4].mxu1  ;;  %1576 = vmatprep.mubr.msk.f32.mxu1 %vm555_vm6, %v543_v59 }
 0x1cd   : > { %v546_v62 = vmax.f32 %v1559_v61, 0.0  ;;  %v534_v63 = vpop.f32.mrb[5].mxu1  ;;  %1577 = vmatmul.mubr.msk.f32.vlgmr.msra.gmra.mrb[6].mxu1 %vm555_vm6, %v544_v60 }
 0x1ce   : > { %v545_v1 = vmax.f32 %v534_v63, 0.0  ;;  %1694 = vmatpush3.bf16.msra.mxu1 %v1835_v11 }
 0x1cf   : > { %1696 = vmatprep.subr.bf16.mxu1 %v1839_v19 }
 0x1d0   : > { %1579 = vmatprep.mubr.msk.f32.mxu1 %vm555_vm6, %v545_v1 }
 0x1d1   : > { %1580 = vmatmul.mubr.msk.f32.gmra.mrb[8].mxu1 %vm555_vm6, %v546_v62 }
 0x1d2   : > { %1698 = vmatpush3.bf16.msra.mxu1 %v1839_v19 }
 0x1d3   : > { %1711 = vmatprep.subr.bf16.mxu1 %v1912_v2 }
 0x2a0   : > { %v1578_v17 = vpop.f32.mrb[6].mxu1 }
 0x2a1   : > { %v634_v18 = vpop.f32.mrb[7].mxu1 }
 0x2a2   : > { %653 = vxpose.xlu0.b32.start [1/4] (short) (narrow) %v634_v18, 16 }
 0x2a4   : > { %v1581_v20 = vpop.f32.mrb[8].mxu1 }
 0x2a5   : > { %v644_v21 = vpop.f32.mrb[9].mxu1 }
 0x2a6   : > { %654 = vxpose.xlu0.b32.cont [2/4] (short) (narrow) %v1578_v17, 16 }
 0x2aa   : > { %655 = vxpose.xlu0.b32.cont [3/4] (short) (narrow) %v644_v21, 16 }
 0x2ae   : > { %656 = vxpose.xlu0.b32.end [4/4] (short) (narrow) %v1581_v20, 16 }
 0x2d7   : > { %1226 = vrot.lane.b32.xlu0 %v2067_v32, %s1916_s23 }
 0x322   : > { %v669_v24 = vpop.trf.xlu0 }
 0x323   : > { %1429 = vmatmul.mubr.msk.f32.vlgmr.msra.gmra.mrb[2].mxu0 %vm263_vm1, %v669_v24  ;;  %1590 = vmatprep.mubr.msk.f32.mxu1 %vm263_vm1, %v669_v24 }
 0x324   : > { %1686 = vmatpush1.bf16.msra.mxu0 %v1838_v22  ;;  %793 = vmatprep.mubr.f32.mxu0 %v1914_v7 }
 0x325   : > { %1688 = vmatprep.subr.bf16.mxu0 %v1840_v23 }
 0x326   : > { %v670_v26 = vpop.trf.xlu0 }
 0x327   : > { %1430 = vmatmul.mubr.msk.f32.gmra.mrb[4].mxu0 %vm263_vm1, %v670_v26  ;;  %1591 = vmatmul.mubr.msk.f32.vlgmr.msra.gmra.mrb[10].mxu1 %vm263_vm1, %v670_v26 }
 0x328   : > { %1690 = vmatpush1.bf16.msra.mxu0 %v1842_v25  ;;  %862 = vmatprep.mubr.f32.mxu0 %v1914_v7 }
 0x329   : > { %1699 = vmatprep.subr.bf16.mxu0 %v1912_v2  ;;  %1616 = vmatprep.mubr.msk.f32.mxu1 %vm1913_vm0, %v1914_v7 }
 0x32b   : > { %1431 = vmatmul.mubr.msk.f32.vlgmr.msra.gmra.mrb[6].mxu0 %vm263_vm1, %v669_v24 }
 0x32c   : > { %868 = vmatprep.mubr.f32.mxu0 %v1914_v7  ;;  %1701 = vmatpush3.bf16.msra.mxu0 %v2015_v8 }
 0x32d   : > { %1702 = vmatprep.subr.bf16.mxu0 %v1912_v2 }
 0x32f   : > { %1432 = vmatmul.mubr.msk.f32.gmra.mrb[8].mxu0 %vm263_vm1, %v670_v26 }
 0x330   : > { %1704 = vmatpush3.bf16.msra.mxu0 %v2020_v9  ;;  %1609 = vmatprep.mubr.msk.f32.mxu0 %vm1913_vm0, %v1914_v7 }
 0x331   : > { %1705 = vmatprep.subr.bf16.mxu0 %v1912_v2 }
 0x334   : > { %1707 = vmatpush3.bf16.msra.mxu0 %v1470_v30 }
 0x335   : > { %1708 = vmatprep.subr.bf16.mxu0 %v1912_v2 }
 0x338   : > { %1710 = vmatpush3.bf16.msra.mxu0 %v1471_v35 }
 0x339   : > { %1720 = vmatprep.subr.bf16.mxu0 %v1912_v2 }
 0x3f6   : > { %v789_v27 = vpop.f32.mrb[2].mxu0 }
 0x3f7   : > { %v948_v28 = vrot.slane %v789_v27, 1  ;;  %v791_v29 = vpop.f32.mrb[3].mxu0 }
 0x3f8   : > { %v957_v9 = vrot.slane %v791_v29, 3  ;;  %v954_v45 = vrot.slane %v791_v29, 2 }
 0x3f9   : > { %949 = vrot.lane.b32.xlu1 %v948_v28, %s1916_s23  ;;  %v1227_v28 = vpop.permute.xlu0 %1226 }
 0x3fa   : > { %v795_v8 = vpop.f32.mrb[4].mxu0  ;;  %v1592_v31 = vpop.f32.mrb[10].mxu1 }
 0x3fb   : > { %v796_v33 = vpop.f32.mrb[5].mxu0  ;;  %v939_v34 = vpop.f32.mrb[11].mxu1 }
 0x3fd   : > { %958 = vrot.lane.b32.xlu1 %v957_v9, %s1916_s23 }
 0x3fe   : > { %v864_v36 = vpop.f32.mrb[6].mxu0 }
 0x3ff   : > { %v966_v37 = vrot.slane %v864_v36, 5  ;;  %v866_v38 = vpop.f32.mrb[7].mxu0  ;;  %v963_v48 = vrot.slane %v864_v36, 4 }
 0x400   : > { %v975_v40 = vrot.slane %v866_v38, 7  ;;  %v972_v51 = vrot.slane %v866_v38, 6 }
 0x401   : > { %967 = vrot.lane.b32.xlu1 %v966_v37, %s1916_s23 }
 0x402   : > { %v870_v39 = vpop.f32.mrb[8].mxu0 }
 0x403   : > { %v871_v41 = vpop.f32.mrb[9].mxu0  ;;  %v1319_v39 = vlaneseq }
 0x405   : > { %976 = vrot.lane.b32.xlu1 %v975_v40, %s1916_s23  ;;  %v1320_v41 = vand.u32 127, %v1319_v39 }
 0x407   : > { %vm1331_vm8 = vcmp.ge.s32.totalorder %v1320_v41, 16 }
 0x409   : > { %1805 = vrot.lane.b32.xlu1 %v2041_v15, %s1915_s17 }
 0x40d   : > { %1810 = vrot.lane.b32.xlu1 %v1809_v43, %s1916_s23 }
 0x411   : > { %1143 = vrot.lane.b32.xlu1 %v1446_v4, %s1916_s23 }
 0x415   : > { %1815 = vrot.lane.b32.xlu1 %v2045_v16, %s1916_s23  ;;  %s226_s23 = sand.u32 1, %s1902_s19  }
 0x416   : > { %s227_s8 = scalar_lea.vmem [#allocation2], %s226_s23  ;;  %s1336_s13 = scalar_lea.sflag [#allocation3], %s226_s23 }
 0x417   : > { %s1348_s9 = sshll.u32 %s227_s8, 4  ;;  %s2204_s9 = int_to_ptr.vmem [resolvable:$true] %s1348_s9 }
 0x418   : > { %s1848_s14 = scalar_lea.vmem %s2204_s9, 16  ;;  %p1855_p0 = scmp.lt.s32.totalorder %s2204_s9, %s1853_s15 }
 0x419   : > { %355 = vrot.lane.b32.xlu1 %v2067_v32, %s1915_s17  ;;  %s1918_s17 = smov 32   ;;  %p1849_p11 = scmp.ne.s32.totalorder %s2204_s9, %s1848_s14 }
 0x41a   : > { %p1856_p1 = scmp.lt.s32.totalorder %s1854_s16, %s1848_s14 }
 0x41b   : > { %p1850_p12 = pnand %p1849_p11, %p1988_p5 }
 0x41c   : > { %p1857_p2 = por %p1856_p1, %p1855_p0 }
 0x41d   : > { %1820 = vrot.lane.b32.xlu1 %v2033_v13, %s1918_s17  ;;  %p1851_p13 = pneg %p1850_p12 }
 0x41f   : > { %p1858_p3 = pnand %p1857_p2, %p1851_p13 }
 0x421   : > { %1825 = vrot.lane.b32.xlu1 %v2045_v16, %s1918_s17 }
 0x425   : > { %1243 = vrot.lane.b32.xlu1 %v2067_v32, %s1918_s17 }
 0x46b   : > { %v950_v44 = vpop.permute.xlu1 %949 }
 0x46c   : > { %v952_v46 = vadd.f32 %v950_v44, %v789_v27 }
 0x46e   : > { %v956_v47 = vadd.f32 %v954_v45, %v952_v46 }
 0x46f   : > { %v959_v15 = vpop.permute.xlu1 %958 }
 0x470   : > { %v961_v49 = vadd.f32 %v959_v15, %v956_v47 }
 0x472   : > { %v965_v3 = vadd.f32 %v963_v48, %v961_v49 }
 0x473   : > { %v968_v50 = vpop.permute.xlu1 %967 }
 0x474   : > { %v970_v52 = vadd.f32 %v968_v50, %v965_v3 }
 0x476   : > { %v974_v53 = vadd.f32 %v972_v51, %v970_v52 }
 0x477   : > { %v977_v0 = vpop.permute.xlu1 %976 }
 0x478   : > { %v979_v4 = vadd.f32 %v977_v0, %v974_v53 }
 0x47a   : > { %v980_v54 = vadd.f32 %v1592_v31, %v979_v4 }
 0x47b   : > { %v1806_v56 = vpop.permute.xlu1 %1805 }
 0x47c   : > { %v981_v57 = vmul.f32 0.015625, %v980_v54  ;;  %v1808_v58 = vunpack.i.h.bf16 %v1806_v56  ;;  %v1807_v59 = vunpack.i.l.bf16 %v1806_v56 }
 0x47e   : > { %v984_v60 = vadd.f32 %v982_v42, %v981_v57  ;;  %v1712_v61 = vpack.c.bf16 %v1808_v58, %v1807_v59 }
 0x47f   : > { %v1811_v62 = vpop.permute.xlu1 %1810 }
 0x480   : > { %1610 = vmatmul.mubr.msk.f32.vlgmr.msra.gmra.mrb[10].mxu0 %vm555_vm6, %v984_v60  ;;  %1713 = vmatpush3.bf16.msra.mxu1 %v1712_v61  ;;  %v1813_v1 = vunpack.i.h.bf16 %v1811_v62 }
 0x481   : > { %1714 = vmatprep.subr.bf16.mxu1 %v1912_v2  ;;  %1638 = vmatprep.mubr.msk.f32.mxu0 %vm1913_vm0, %v1914_v7 }
 0x483   : > { %v1144_v63 = vpop.permute.xlu1 %1143 }
 0x484   : > { %v1715_v17 = vpack.c.bf16 %v1144_v63, %v1813_v1 }
 0x487   : > { %v1816_v5 = vpop.permute.xlu1 %1815 }
 0x488   : > { %v1818_v6 = vunpack.i.h.bf16 %v1816_v5  ;;  %v1817_v10 = vunpack.i.l.bf16 %v1816_v5 }
 0x48a   : > { %v1718_v18 = vpack.c.bf16 %v1818_v6, %v1817_v10 }
 0x48b   : > { %v356_v13 = vpop.permute.xlu1 %355 }
 0x48c   : > { %v428_v16 = vadd.f32 %v2101_v55, %v356_v13 }
 0x48f   : > { %v1821_v32 = vpop.permute.xlu1 %1820 }
 0x490   : > { %v1823_v19 = vunpack.i.h.bf16 %v1821_v32  ;;  %v1822_v20 = vunpack.i.l.bf16 %v1821_v32 }
 0x492   : > { %v1721_v21 = vpack.c.bf16 %v1823_v19, %v1822_v20 }
 0x493   : > { %v1826_v22 = vpop.permute.xlu1 %1825 }
 0x494   : > { %v1828_v23 = vunpack.i.h.bf16 %v1826_v22  ;;  %v1827_v24 = vunpack.i.l.bf16 %v1826_v22  ;;  %1722 = vmatpush3.bf16.msra.mxu0 %v1721_v21 }
 0x495   : > { %1723 = vmatprep.subr.bf16.mxu0 %v1912_v2 }
 0x496   : > { %v1724_v25 = vpack.c.bf16 %v1828_v23, %v1827_v24 }
 0x497   : > { %v1244_v31 = vpop.permute.xlu1 %1243 }
 0x498   : > { %1725 = vmatpush3.bf16.msra.mxu0 %v1724_v25 }
 0x553   : > { %v1057_v11 = vpop.f32.mrb[10].mxu0 }
 0x554   : > { %v1847_v12 = vadd.low.f32.bf16 %v1057_v11, %v1811_v62  ;;  %v1611_v14 = vpop.f32.mrb[11].mxu0 }
 0x556   : > { %1617 = vmatmul.mubr.msk.f32.vlgmr.msra.gmra.mrb[12].mxu1 %vm1067_vm7, %v1847_v12 }
 0x557   : > { %1716 = vmatpush3.bf16.msra.mxu1 %v1715_v17  ;;  %1627 = vmatprep.mubr.msk.f32.mxu1 %vm1913_vm0, %v1914_v7 }
 0x558   : > { %1717 = vmatprep.subr.bf16.mxu1 %v1912_v2 }
 0x55b   : > { %1719 = vmatpush3.bf16.msra.mxu1 %v1718_v18 }
 0x55e   : > { %1628 = vmatmul.mubr.msk.f32.vlgmr.msra.gmra.mrb[14].mxu1 %vm263_vm1, %v428_v16 }
 0x629   : > { %v1137_v7 = vpop.f32.mrb[12].mxu1 }
 0x62a   : > { %v1618_v26 = vpop.f32.mrb[13].mxu1 }
 0x631   : > { %v1222_v27 = vpop.f32.mrb[14].mxu1 }
 0x632   : > { %v1223_v29 = vadd.f32 %v1222_v27, %v1137_v7  ;;  %v1629_v55 = vpop.f32.mrb[15].mxu1 }
 0x634   : > { %v1229_v30 = vadd.f32 %v1227_v28, %v1223_v29 }
 0x636   : > { %v1230_v8 = vmax.f32 %v1229_v30, 0.0 }
 0x638   : > { %1639 = vmatmul.mubr.msk.f32.vlgmr.msra.gmra.mrb[12].mxu0 %vm263_vm1, %v1230_v8 }
 0x70b   : > { %v1315_v9 = vpop.f32.mrb[12].mxu0 }
 0x70c   : > { %v1316_v33 = vadd.f32 %v1315_v9, %v1244_v31  ;;  %v1640_v34 = vpop.f32.mrb[13].mxu0 }
 0x70e   : > { %v1322_v35 = vand.u32 2147483647, %v1316_v33  ;;  %v1321_v42 = vmax.f32 %v1316_v33, 0.0 }
 0x710   : > { %v1323_v2 = vsub.f32 0.0, %v1322_v35 }
 0x712   : > { %v1324_v36 = vmul.f32 1.442695, %v1323_v2 }
 0x714   : > { %1843 = vpow2.f32 %v1324_v36 }
 0x71e   : > { %v1844_v37 = vpop.eup %1843 }
 0x71f   : > { %v1326_v38 = vadd.f32 1.0, %v1844_v37 }
 0x721   : > { %1845 = vlog2.f32 %v1326_v38 }
 0x72b   : > { %v1846_v40 = vpop.eup %1845 }
 0x72c   : > { %v1328_v43 = vmul.f32 0.6931472, %v1846_v40 }
 0x72e   : > { %v1329_v44 = vadd.f32 %v1328_v43, %v1321_v42 }
 0x730   : > { %v1330_v45 = vadd.f32 1e-05, %v1329_v44 }
 0x732   : > { %v1332_v46 = vsel %vm1331_vm8, %v1330_v45, %v1316_v33 }
 0x733   : > { %1334 = vst.msk [vmem:[%s227_s8] sm:$0x1] %vm1333_vm9, %v1332_v46 }
 0x734   : > { %1861 = shalt.err (!%p1858_p3)
}
 0x735   : > { %s1862_s25 = scalar_lea.hbm %s2202_s12, 16  ;;  %s1866_s6 = scalar_lea.hbm %s2249_s5, 32 }
 0x736   : > { %p1863_p4 = scmp.ne.s32.totalorder %s2202_s12, %s1862_s25  ;;  %p1867_p9 = scmp.lt.u32.totalorder %s2202_s12, %s2249_s5 }
 0x737   : > { %p1868_p10 = scmp.lt.u32.totalorder %s1866_s6, %s1862_s25  ;;  %p1870_p12 = scmp.lt.u32.totalorder %s1862_s25, %s2202_s12 }
 0x738   : > { %p1864_p7 = pnand %p1863_p4, %p1988_p5 }
 0x739   : > { %p1869_p11 = por %p1868_p10, %p1867_p9 }
 0x73a   : > { %p1865_p8 = pneg %p1864_p7 }
 0x73b   : > { %p1871_p13 = por %p1870_p12, %p1869_p11 }
 0x73d   : > { %p1872_p0 = pnand %p1871_p13, %p1865_p8 }
 0x73f   : > { %1875 = shalt.err (!%p1872_p0)
}
 0x740   : > { %1738 = dma.vmem_to_hbm [thread:$0]  (%p1988_p5), %s2204_s9, 16, %s2202_s12, %s1336_s13  }
 0x741 PF: > { %p1744_p1 = scmp.ge.s32.totalorder %s1910_s21, 2  ;;  %s1360_s7 = sand.u32 1, %s1898_s18  }
 0x742   : > { %s1361_s8 = scalar_lea.sflag [#allocation3], %s1360_s7 }
 0x743   : > { %p1741_p2 = pnand %p1744_p1, %p1992_p6 }
 0x745   : > { %1893 = dma.done.wait (!%p1741_p2), %s1361_s8, 16  }
 0x746   : > { %1895 = vsyncadd (!%p1741_p2), %s1361_s8, 4294967280  ;;  %p15_p3 = scmp.ge.s32.totalorder %s1975_s24, 4   ;;  %s2254_s18 = smov %s1902_s19 }
 0x747   : > { %s2255_s19 = smov %s1906_s20  ;;  %s2256_s20 = smov %s1986_s27 }
 0x748   : > { %s2257_s21 = smov %s1975_s24  ;;  %17 = sbr.rel (!%p15_p3) target bundleno = 3 (0x3), region = 78 }
 0x74f   :  { %1365 = vsyncpa [#allocation3], 1 }
 0x750   :  { %1367 = vsyncpa [#allocation3 + $0x1], 1 }

</bundles_post_ra>
